<compile_context>
chip_gen: v7x
topology: tpu7x:2x2x1
jax: 0.10.0
libtpu: 0.0.40
codegen_flags: <defaults>
</compile_context>

<pallas_src>
import functools
import jax
import jax.numpy as jnp
from jax.experimental import pallas as pl
from jax.experimental.pallas import tpu as pltpu

SMALL_M = 8                               # rows below this -> plain XLA (grid overhead dominates)
VMEM_BUDGET = 20 * 1024 * 1024            # double-buffered working-set target per matmul
VMEM_LIMIT = 32 * 1024 * 1024             # explicit scoped-VMEM limit (safe on v5e/v6e/v7x)


def _round_up(x, m):
    return (x + m - 1) // m * m


def _apply_act(x, act):
    if act is None:
        return x
    if act == "leaky_relu":
        return jnp.where(x >= 0, x, 0.2 * x)
    if act == "relu":
        return jnp.maximum(x, 0)
    if act == "tanh":
        return jnp.tanh(x)
    raise ValueError(act)


# ---------------------------------------------------------------------------
# Pallas kernels
# ---------------------------------------------------------------------------
def _mm_kernel(a_ref, b_ref, sc_ref, sh_ref, bias_ref, o_ref, *,
               pre_act, post_act, affine, has_bias):
    """Single-K-block matmul: fused (deferred-BN affine + pre-act) on the LHS tile,
    bias + post-act epilogue.  bf16 MXU operands, fp32 accumulation."""
    a = a_ref[...]
    if affine or pre_act is not None:
        af = a.astype(jnp.float32)
        if affine:
            af = af * sc_ref[...] + sh_ref[...]
        af = _apply_act(af, pre_act)
        a = af.astype(jnp.bfloat16)
    out = jnp.dot(a, b_ref[...], preferred_element_type=jnp.float32)
    if has_bias:
        out = out + bias_ref[...]
    out = _apply_act(out, post_act)
    o_ref[...] = out.astype(o_ref.dtype)


def _mm_kernel_ksplit(a_ref, b_ref, sc_ref, sh_ref, bias_ref, o_ref, acc_ref, *,
                      pre_act, post_act, affine, has_bias):
    """3-axis-grid variant with a resident fp32 accumulator (used only when the
    full-K strip does not fit the VMEM budget)."""
    @pl.when(pl.program_id(2) == 0)
    def _():
        acc_ref[...] = jnp.zeros_like(acc_ref)

    a = a_ref[...]
    if affine or pre_act is not None:
        af = a.astype(jnp.float32)
        if affine:
            af = af * sc_ref[...] + sh_ref[...]
        af = _apply_act(af, pre_act)
        a = af.astype(jnp.bfloat16)
    acc_ref[...] += jnp.dot(a, b_ref[...], preferred_element_type=jnp.float32)

    @pl.when(pl.program_id(2) == pl.num_programs(2) - 1)
    def _():
        out = acc_ref[...]
        if has_bias:
            out = out + bias_ref[...]
        out = _apply_act(out, post_act)
        o_ref[...] = out.astype(o_ref.dtype)


def _bn_stats_kernel(x_ref, sum_ref, sq_ref):
    """Per-channel sum / sum-of-squares accumulated across the row grid (fp32)."""
    @pl.when(pl.program_id(0) == 0)
    def _():
        sum_ref[...] = jnp.zeros_like(sum_ref)
        sq_ref[...] = jnp.zeros_like(sq_ref)
    x = x_ref[...].astype(jnp.float32)
    sum_ref[...] += jnp.sum(x, axis=0, keepdims=True)
    sq_ref[...] += jnp.sum(x * x, axis=0, keepdims=True)


# ---------------------------------------------------------------------------
# Fused matmul wrapper
# ---------------------------------------------------------------------------
def _select_tiles(M, K, N, out_itemsize):
    # Lane-dense, 128-aligned N tile.
    np_min = _round_up(max(N, 128), 128)
    if np_min <= 512:
        tn = np_min
    elif np_min % 512 == 0:
        tn = 512
    elif np_min % 256 == 0:
        tn = 256
    else:
        tn = 128

    # Keep >=2 M blocks when M is large so v7x's two TensorCores both get work.
    if M >= 2048:
        tm = 1024
    elif M >= 1024:
        tm = 512
    elif M >= 512:
        tm = 256
    elif M >= 128:
        tm = 128
    else:
        tm = _round_up(M, 8)

    kp = _round_up(K, 128)

    def vbytes(tm_, tn_, tk_, split):
        t = 2 * (tm_ * tk_ * 2 + tk_ * tn_ * 2 + tm_ * tn_ * out_itemsize
                 + tk_ * 8 + tn_ * 4)
        if split:
            t += tm_ * tn_ * 4
        return t

    if vbytes(tm, tn, kp, False) <= VMEM_BUDGET:
        return tm, tn, kp, False            # collapsed K: weights resident, no fp32 acc
    for tk in (2048, 1024, 512, 256, 128):
        if vbytes(tm, tn, tk, True) <= VMEM_BUDGET:
            return tm, tn, tk, True
    return min(tm, 256), min(tn, 256), 128, True


def matmul_fused(a, b, scale_k, shift_k, bias, *, pre_act=None, post_act=None,
                 affine=False, out_dtype=jnp.bfloat16):
    """post_act( pre_act(A*scale+shift) @ B + bias ).  A, B in bf16, fp32 accumulation."""
    M, K = a.shape
    K2, N = b.shape
    assert K == K2

    if M < SMALL_M:
        af = a.astype(jnp.float32)
        if affine:
            af = af * scale_k.reshape(1, K) + shift_k.reshape(1, K)
        af = _apply_act(af, pre_act)
        out = jnp.dot(af, b.astype(jnp.float32))
        if bias is not None:
            out = out + bias.reshape(1, N)
        return _apply_act(out, post_act).astype(out_dtype)

    out_itemsize = jnp.dtype(out_dtype).itemsize
    tm, tn, tk, split = _select_tiles(M, K, N, out_itemsize)
    Mp = _round_up(M, tm)
    Np = _round_up(max(N, 128), tn)
    Kp = _round_up(K, tk)

    a_p = a.astype(jnp.bfloat16)
    b_p = b.astype(jnp.bfloat16)
    if Mp != M or Kp != K:
        a_p = jnp.pad(a_p, ((0, Mp - M), (0, Kp - K)))
    if Kp != K or Np != N:
        b_p = jnp.pad(b_p, ((0, Kp - K), (0, Np - N)))

    sc = jnp.ones((K,), jnp.float32) if scale_k is None else scale_k.astype(jnp.float32)
    sh = jnp.zeros((K,), jnp.float32) if shift_k is None else shift_k.astype(jnp.float32)
    sc_p = jnp.pad(sc.reshape(1, K), ((0, 0), (0, Kp - K)), constant_values=1.0)
    sh_p = jnp.pad(sh.reshape(1, K), ((0, 0), (0, Kp - K)))
    bias_v = jnp.zeros((N,), jnp.float32) if bias is None else bias.astype(jnp.float32)
    bias_p = jnp.pad(bias_v.reshape(1, N), ((0, 0), (0, Np - N)))

    if not split:
        kern = functools.partial(_mm_kernel, pre_act=pre_act, post_act=post_act,
                                 affine=affine, has_bias=bias is not None)
        out = pl.pallas_call(
            kern,
            out_shape=jax.ShapeDtypeStruct((Mp, Np), out_dtype),
            grid_spec=pltpu.PrefetchScalarGridSpec(
                num_scalar_prefetch=0,
                grid=(Mp // tm, Np // tn),
                in_specs=[
                    pl.BlockSpec((tm, Kp), lambda i, j: (i, 0)),
                    pl.BlockSpec((Kp, tn), lambda i, j: (0, j)),
                    pl.BlockSpec((1, Kp), lambda i, j: (0, 0)),
                    pl.BlockSpec((1, Kp), lambda i, j: (0, 0)),
                    pl.BlockSpec((1, tn), lambda i, j: (0, j)),
                ],
                out_specs=pl.BlockSpec((tm, tn), lambda i, j: (i, j)),
            ),
            compiler_params=pltpu.CompilerParams(
                dimension_semantics=("parallel", "parallel"),
                vmem_limit_bytes=VMEM_LIMIT),
        )(a_p, b_p, sc_p, sh_p, bias_p)
    else:
        kern = functools.partial(_mm_kernel_ksplit, pre_act=pre_act, post_act=post_act,
                                 affine=affine, has_bias=bias is not None)
        out = pl.pallas_call(
            kern,
            out_shape=jax.ShapeDtypeStruct((Mp, Np), out_dtype),
            grid_spec=pltpu.PrefetchScalarGridSpec(
                num_scalar_prefetch=0,
                grid=(Mp // tm, Np // tn, Kp // tk),
                in_specs=[
                    pl.BlockSpec((tm, tk), lambda i, j, k: (i, k)),
                    pl.BlockSpec((tk, tn), lambda i, j, k: (k, j)),
                    pl.BlockSpec((1, tk), lambda i, j, k: (0, k)),
                    pl.BlockSpec((1, tk), lambda i, j, k: (0, k)),
                    pl.BlockSpec((1, tn), lambda i, j, k: (0, j)),
                ],
                out_specs=pl.BlockSpec((tm, tn), lambda i, j, k: (i, j)),
                scratch_shapes=[pltpu.VMEM((tm, tn), jnp.float32)],
            ),
            compiler_params=pltpu.CompilerParams(
                dimension_semantics=("parallel", "parallel", "arbitrary"),
                vmem_limit_bytes=VMEM_LIMIT),
        )(a_p, b_p, sc_p, sh_p, bias_p)

    if Mp != M or Np != N:
        out = out[:M, :N]
    return out


# ---------------------------------------------------------------------------
# BatchNorm2d (training-mode batch statistics) -> deferred (scale, shift)
# ---------------------------------------------------------------------------
def bn_scale_shift(x_nhwc, gamma, beta, eps=1e-5):
    """Returns per-channel (scale, shift) with BN(x) == x*scale + shift.
    The apply is deferred into the consuming conv's fused pre-activation."""
    n, h, w, c = x_nhwc.shape
    M = n * h * w
    x2 = x_nhwc.reshape(M, c)
    g = gamma.astype(jnp.float32)
    b = beta.astype(jnp.float32)

    if M < SMALL_M:
        xf = x2.astype(jnp.float32)
        mean = jnp.mean(xf, axis=0)
        var = jnp.mean(jnp.square(xf - mean), axis=0)
    else:
        if M >= 2048:
            tr = 1024
        elif M >= 512:
            tr = 256
        else:
            tr = _round_up(M, 8)
        Mp = _round_up(M, tr)
        x_p = x2 if Mp == M else jnp.pad(x2, ((0, Mp - M), (0, 0)))
        sums, sqs = pl.pallas_call(
            _bn_stats_kernel,
            out_shape=(jax.ShapeDtypeStruct((1, c), jnp.float32),
                       jax.ShapeDtypeStruct((1, c), jnp.float32)),
            grid_spec=pltpu.PrefetchScalarGridSpec(
                num_scalar_prefetch=0,
                grid=(Mp // tr,),
                in_specs=[pl.BlockSpec((tr, c), lambda i: (i, 0))],
                out_specs=(pl.BlockSpec((1, c), lambda i: (0, 0)),
                           pl.BlockSpec((1, c), lambda i: (0, 0))),
            ),
            compiler_params=pltpu.CompilerParams(
                dimension_semantics=("arbitrary",),
                vmem_limit_bytes=VMEM_LIMIT),
        )(x_p)
        mean = (sums / M).reshape(c)
        # NOTE: E[x^2]-E[x]^2 in fp32 over bf16 data; adequate here (Welford is a TODO).
        var = jnp.maximum((sqs / M).reshape(c) - jnp.square(mean), 0.0)

    scale = g * jax.lax.rsqrt(var + eps)
    shift = b - mean * scale
    return scale, shift


# ---------------------------------------------------------------------------
# Conv lowerings (im2col glue in JAX; affine/act/bias/matmul fused in Pallas)
# ---------------------------------------------------------------------------
def _build_patches(parts, n_taps, stride, out_hw):
    """im2col over a lazily-concatenated list of parts [(x_nhwc, scale, shift)].
    Border padding uses the per-channel value that maps to 0 after the deferred BN
    affine, so fused act(x*scale+shift) reproduces zero padding of the normalized input."""
    ho, wo = out_hw
    n = parts[0][0].shape[0]
    cols, sc_list, sh_list = [], [], []
    affine = any(sc is not None for (_, sc, _) in parts)
    T = n_taps * n_taps
    for (x, sc, sh) in parts:
        c = x.shape[-1]
        if sc is None:
            xp = jnp.pad(x, ((0, 0), (1, 1), (1, 1), (0, 0)))
            sc_v = jnp.ones((c,), jnp.float32)
            sh_v = jnp.zeros((c,), jnp.float32)
        else:
            neutral = -sh / jnp.where(jnp.abs(sc) > 1e-12, sc, 1.0)
            base = jnp.broadcast_to(
                neutral.astype(x.dtype).reshape(1, 1, 1, c),
                (n, x.shape[1] + 2, x.shape[2] + 2, c))
            xp = jax.lax.dynamic_update_slice(base, x, (0, 1, 1, 0))
            sc_v, sh_v = sc, sh
        for ky in range(n_taps):
            for kx in range(n_taps):
                cols.append(xp[:, ky:ky + stride * ho:stride,
                               kx:kx + stride * wo:stride, :])
        sc_list.append(jnp.tile(sc_v, T))    # tap-major, channel-minor K layout
        sh_list.append(jnp.tile(sh_v, T))
    patches = jnp.concatenate(cols, axis=-1).reshape(n * ho * wo, -1)
    return patches, jnp.concatenate(sc_list), jnp.concatenate(sh_list), affine


def conv_down(parts, w_mat, pre_act):
    """nn.Conv2d(cin, cout, 4, stride=2, padding=1, bias=False) with preceding
    LeakyReLU and any deferred BN affine fused into the matmul kernel."""
    n, h, w, _ = parts[0][0].shape
    ho, wo = h // 2, w // 2
    patches, sck, shk, affine = _build_patches(parts, 4, 2, (ho, wo))
    out = matmul_fused(patches, w_mat, sck, shk, None,
                       pre_act=pre_act, post_act=None, affine=affine,
                       out_dtype=jnp.bfloat16)
    return out.reshape(n, ho, wo, -1)


def conv_up(parts, w_mat, cout, bias4=None, pre_act="relu", post_act=None,
            out_dtype=jnp.bfloat16):
    """nn.ConvTranspose2d(cin, cout, 4, stride=2, padding=1) as a SINGLE matmul:
    shared 3x3-neighborhood im2col x phase-concatenated weights -> lane-dense
    (M, 4*cout) output, then one pixel shuffle.  ReLU + deferred BN of the input
    (and bias / Tanh of the output) are fused in-kernel."""
    n, h, w, _ = parts[0][0].shape
    patches, sck, shk, affine = _build_patches(parts, 3, 1, (h, w))
    out = matmul_fused(patches, w_mat, sck, shk, bias4,
                       pre_act=pre_act, post_act=post_act, affine=affine,
                       out_dtype=out_dtype)
    out = out.reshape(n, h, w, 2, 2, cout)
    out = out.transpose(0, 1, 3, 2, 4, 5).reshape(n, 2 * h, 2 * w, cout)
    return out


# ---------------------------------------------------------------------------
# Parameters (PyTorch layout) + one-time matmul-ready preparation
# ---------------------------------------------------------------------------
def init_unet_params(key, input_nc, output_nc, num_downs, ngf):
    specs = [dict(outer=output_nc, inner=ngf, inp=input_nc, outermost=True, innermost=False)]
    for outer, inner in [(ngf, ngf * 2), (ngf * 2, ngf * 4), (ngf * 4, ngf * 8)]:
        specs.append(dict(outer=outer, inner=inner, inp=outer, outermost=False, innermost=False))
    for _ in range(num_downs - 5):
        specs.append(dict(outer=ngf * 8, inner=ngf * 8, inp=ngf * 8,
                          outermost=False, innermost=False))
    specs.append(dict(outer=ngf * 8, inner=ngf * 8, inp=ngf * 8,
                      outermost=False, innermost=True))

    params = []
    for s in specs:
        key, k1, k2, k3 = jax.random.split(key, 4)
        p = dict(spec=s)
        p['down_w'] = 0.05 * jax.random.normal(k1, (s['inner'], s['inp'], 4, 4), jnp.float32)
        up_in = s['inner'] if s['innermost'] else s['inner'] * 2
        p['up_w'] = 0.05 * jax.random.normal(k2, (up_in, s['outer'], 4, 4), jnp.float32)
        if s['outermost']:
            p['up_b'] = 0.05 * jax.random.normal(k3, (s['outer'],), jnp.float32)
        else:
            p['up_bn_g'] = jnp.ones((s['outer'],), jnp.float32)
            p['up_bn_b'] = jnp.zeros((s['outer'],), jnp.float32)
            if not s['innermost']:
                p['down_bn_g'] = jnp.ones((s['inner'],), jnp.float32)
                p['down_bn_b'] = jnp.zeros((s['inner'],), jnp.float32)
        params.append(p)
    return params


def prepare_params(raw_params):
    """One-time transforms: im2col weight matrices (bf16); transposed-conv weights
    packed as a 3x3-tap x (concatenated-phase) matrix whose K blocks match the lazy
    skip-concat parts, so the per-forward path does no weight reshaping."""
    prepared = []
    for p in raw_params:
        s = p['spec']
        q = dict(spec=s)
        cin = s['inp']
        # Conv2d weight (O,I,ky,kx) -> (ky,kx,I,O) -> (16*cin, cout).
        q['down_wm'] = (jnp.transpose(p['down_w'], (2, 3, 1, 0))
                        .reshape(16 * cin, s['inner']).astype(jnp.bfloat16))

        up_in = s['inner'] if s['innermost'] else s['inner'] * 2
        cout = s['outer']
        # Flipped/transposed kernel: wf[ky,kx,ci,co] = W[ci,co,3-ky,3-kx].
        wf = jnp.flip(jnp.transpose(p['up_w'], (2, 3, 0, 1)), axis=(0, 1))
        # Shared 3x3-neighborhood taps; phase (r,c) (output pixel (2i+r,2j+c)) uses
        # taps (dy,dx) with dy in {r,r+1}, dx in {c,c+1}: Wc[dy,dx] = wf[2dy-r, 2dx-c].
        wc = jnp.zeros((3, 3, up_in, 4 * cout), jnp.float32)
        for r in range(2):
            for c in range(2):
                ph = 2 * r + c
                for a in range(2):
                    for b in range(2):
                        wc = wc.at[a + r, b + c, :, ph * cout:(ph + 1) * cout].set(
                            wf[r + 2 * a, c + 2 * b])
        part_sizes = [s['inner']] if s['innermost'] else [s['inner'], s['inner']]
        blocks, off = [], 0
        for pc in part_sizes:
            blocks.append(wc[:, :, off:off + pc, :].reshape(9 * pc, 4 * cout))
            off += pc
        q['up_wm'] = jnp.concatenate(blocks, axis=0).astype(jnp.bfloat16)

        if s['outermost']:
            q['up_b4'] = jnp.tile(p['up_b'].astype(jnp.float32), 4)  # per-phase bias layout
        else:
            q['up_bn_g'] = p['up_bn_g']
            q['up_bn_b'] = p['up_bn_b']
            if not s['innermost']:
                q['down_bn_g'] = p['down_bn_g']
                q['down_bn_b'] = p['down_bn_b']
        prepared.append(q)
    return prepared


# ---------------------------------------------------------------------------
# UnetGenerator forward (activations as lazy-concat parts: (tensor, scale, shift))
# ---------------------------------------------------------------------------
def unet_block_forward(x_parts, params, idx):
    p = params[idx]
    s = p['spec']
    if s['outermost']:
        d = conv_down(x_parts, p['down_wm'], pre_act=None)               # downconv
        sub = unet_block_forward([(d, None, None)], params, idx + 1)     # submodule
        # uprelu + upconv(bias) + Tanh fully fused; bf16 all the way.
        return conv_up(sub, p['up_wm'], s['outer'], bias4=p['up_b4'],
                       pre_act="relu", post_act="tanh", out_dtype=jnp.bfloat16)
    elif s['innermost']:
        d = conv_down(x_parts, p['down_wm'], pre_act="leaky_relu")       # downrelu+downconv
        u = conv_up([(d, None, None)], p['up_wm'], s['outer'], pre_act="relu")
        usc, ush = bn_scale_shift(u, p['up_bn_g'], p['up_bn_b'])         # upnorm (deferred)
        return x_parts + [(u, usc, ush)]                                 # lazy skip concat
    else:
        d = conv_down(x_parts, p['down_wm'], pre_act="leaky_relu")       # downrelu+downconv
        dsc, dsh = bn_scale_shift(d, p['down_bn_g'], p['down_bn_b'])     # downnorm (deferred)
        sub = unet_block_forward([(d, dsc, dsh)], params, idx + 1)       # submodule
        u = conv_up(sub, p['up_wm'], s['outer'], pre_act="relu")         # uprelu+upconv
        usc, ush = bn_scale_shift(u, p['up_bn_g'], p['up_bn_b'])         # upnorm (deferred)
        return x_parts + [(u, usc, ush)]


def unet_generator_forward(x_nchw, params):
    x = jnp.transpose(x_nchw, (0, 2, 3, 1)).astype(jnp.bfloat16)  # NCHW -> NHWC, bf16 acts
    y = unet_block_forward([(x, None, None)], params, 0)          # NHWC bf16 (tanh'd)
    return jnp.transpose(y, (0, 3, 1, 2)).astype(jnp.float32)     # cast during final transpose


# ---------------------------------------------------------------------------
def _selfcheck_matmul():
    """Sanity check both matmul paths against a bf16-faithful XLA reference."""
    k1, k2, k3, k4 = jax.random.split(jax.random.PRNGKey(1), 4)

    # Collapsed-K path: affine + leaky_relu pre, padded K and N (<128 lanes).
    M, K, N = 256, 200, 100
    a = jax.random.normal(k1, (M, K), jnp.float32).astype(jnp.bfloat16)
    b = jax.random.normal(k2, (K, N), jnp.float32).astype(jnp.bfloat16)
    sc = 0.5 + jax.random.uniform(k3, (K,), jnp.float32)
    sh = 0.1 * jax.random.normal(k4, (K,), jnp.float32)
    out = matmul_fused(a, b, sc, sh, None, pre_act="leaky_relu",
                       affine=True, out_dtype=jnp.float32)
    af = a.astype(jnp.float32) * sc.reshape(1, K) + sh.reshape(1, K)
    af = jnp.where(af >= 0, af, 0.2 * af).astype(jnp.bfloat16)
    ref = jnp.dot(af.astype(jnp.float32), b.astype(jnp.float32))
    err = jnp.max(jnp.abs(out - ref)) / (jnp.max(jnp.abs(ref)) + 1e-6)
    assert float(err) < 2e-2, float(err)

    # Split-K path: bias + relu post.
    M, K, N = 2048, 4608, 512
    a = jax.random.normal(k1, (M, K), jnp.float32).astype(jnp.bfloat16)
    b = (0.02 * jax.random.normal(k2, (K, N), jnp.float32)).astype(jnp.bfloat16)
    bias = jax.random.normal(k3, (N,), jnp.float32)
    out = matmul_fused(a, b, None, None, bias, post_act="relu", out_dtype=jnp.float32)
    ref = jnp.maximum(jnp.dot(a.astype(jnp.float32), b.astype(jnp.float32))
                      + bias.reshape(1, N), 0)
    err = jnp.max(jnp.abs(out - ref)) / (jnp.max(jnp.abs(ref)) + 1e-6)
    assert float(err) < 2e-2, float(err)


if __name__ == "__main__":
    # Small config consistent with UnetGenerator(input_nc, output_nc, num_downs, ngf).
    input_nc, output_nc, num_downs, ngf = 4, 3, 5, 8
    N, H, W = 2, 32, 32  # spatial must be divisible by 2**num_downs

    _selfcheck_matmul()

    key = jax.random.PRNGKey(0)
    kx, kp = jax.random.split(key)
    x = jax.random.normal(kx, (N, input_nc, H, W), jnp.float32)
    raw = init_unet_params(kp, input_nc, output_nc, num_downs, ngf)
    params = prepare_params(raw)

    fwd = jax.jit(lambda inp: unet_generator_forward(inp, params))
    y = jax.block_until_ready(fwd(x))

    assert y.shape == (N, output_nc, H, W), y.shape
    assert bool(jnp.all(jnp.isfinite(y)))
    assert bool(jnp.all(jnp.abs(y) <= 1.0 + 1e-3))  # Tanh output range
    print("KERNEL_OK")
</pallas_src>

<mosaic_0001>
module attributes {stable_mosaic.version = 11 : i64} {
  func.func @_mm_kernel(%arg0: i32, %arg1: i32, %arg2: memref<128x256xbf16, #tpu.memory_space<vmem>>, %arg3: memref<256x128xbf16, #tpu.memory_space<vmem>>, %arg4: memref<1x256xf32, #tpu.memory_space<vmem>>, %arg5: memref<1x256xf32, #tpu.memory_space<vmem>>, %arg6: memref<1x128xf32, #tpu.memory_space<vmem>>, %arg7: memref<128x128xf32, #tpu.memory_space<vmem>>) attributes {dimension_semantics = [#tpu.dimension_semantics<parallel>, #tpu.dimension_semantics<parallel>], iteration_bounds = array<i64: 2, 1>, scalar_prefetch = 0 : i64, scratch_operands = 0 : i64, tpu.core_type = #tpu.core_type<tc>, window_params = [{transform_indices = @transform_0, window_bounds = array<i64: 128, 256>}, {transform_indices = @transform_1, window_bounds = array<i64: 256, 128>}, {pipeline_mode = #tpu.pipeline_mode<synchronous>, transform_indices = @transform_2, window_bounds = array<i64: 1, 256>}, {pipeline_mode = #tpu.pipeline_mode<synchronous>, transform_indices = @transform_3, window_bounds = array<i64: 1, 256>}, {transform_indices = @transform_4, window_bounds = array<i64: 1, 128>}, {transform_indices = @transform_5, window_bounds = array<i64: 128, 128>}]} {
    %c0 = arith.constant 0 : index
    %c0_0 = arith.constant 0 : index
    %0 = vector.load %arg2[%c0, %c0_0] : memref<128x256xbf16, #tpu.memory_space<vmem>>, vector<128x256xbf16>
    %1 = arith.extf %0 : vector<128x256xbf16> to vector<128x256xf32>
    %c0_1 = arith.constant 0 : index
    %c0_2 = arith.constant 0 : index
    %2 = vector.load %arg4[%c0_1, %c0_2] : memref<1x256xf32, #tpu.memory_space<vmem>>, vector<1x256xf32>
    %3 = vector.broadcast %2 : vector<1x256xf32> to vector<128x256xf32>
    %4 = arith.mulf %1, %3 : vector<128x256xf32>
    %c0_3 = arith.constant 0 : index
    %c0_4 = arith.constant 0 : index
    %5 = vector.load %arg5[%c0_3, %c0_4] : memref<1x256xf32, #tpu.memory_space<vmem>>, vector<1x256xf32>
    %6 = vector.broadcast %5 : vector<1x256xf32> to vector<128x256xf32>
    %7 = arith.addf %4, %6 : vector<128x256xf32>
    %cst = arith.constant 0.000000e+00 : f32
    %8 = vector.broadcast %cst : f32 to vector<128x256xf32>
    %9 = arith.cmpf oge, %7, %8 : vector<128x256xf32>
    %cst_5 = arith.constant 2.000000e-01 : f32
    %10 = vector.broadcast %cst_5 : f32 to vector<128x256xf32>
    %11 = arith.mulf %10, %7 : vector<128x256xf32>
    %12 = arith.select %9, %7, %11 : vector<128x256xi1>, vector<128x256xf32>
    %13 = arith.truncf %12 : vector<128x256xf32> to vector<128x256xbf16>
    %c0_6 = arith.constant 0 : index
    %c0_7 = arith.constant 0 : index
    %14 = vector.load %arg3[%c0_6, %c0_7] : memref<256x128xbf16, #tpu.memory_space<vmem>>, vector<256x128xbf16>
    %cst_8 = arith.constant dense<0.000000e+00> : vector<128x128xf32>
    %15 = tpu.matmul %13, %14, %cst_8 {dimension_numbers = #tpu.dot_dimension_numbers<[1], [0], [0], [1], [0, 0, 1, 1], [], []>} : vector<128x256xbf16>, vector<256x128xbf16>, vector<128x128xf32> -> vector<128x128xf32>
    %c0_9 = arith.constant 0 : index
    %c0_10 = arith.constant 0 : index
    %16 = vector.load %arg7[%c0_9, %c0_10] : memref<128x128xf32, #tpu.memory_space<vmem>>, vector<128x128xf32>
    tpu.vector_store %arg7[%c0_9, %c0_10], %15 {strides = array<i32>} : memref<128x128xf32, #tpu.memory_space<vmem>>, vector<128x128xf32>,
    return
  }
  func.func @transform_0(%arg0: i32, %arg1: i32) -> (i32, i32) {
    %c0_i32 = arith.constant 0 : i32
    %c0_i32_0 = arith.constant 0 : i32
    return %arg0, %c0_i32 : i32, i32
  }
  func.func @transform_1(%arg0: i32, %arg1: i32) -> (i32, i32) {
    %c0_i32 = arith.constant 0 : i32
    %c0_i32_0 = arith.constant 0 : i32
    return %c0_i32, %arg1 : i32, i32
  }
  func.func @transform_2(%arg0: i32, %arg1: i32) -> (i32, i32) {
    %c0_i32 = arith.constant 0 : i32
    %c0_i32_0 = arith.constant 0 : i32
    %c0_i32_1 = arith.constant 0 : i32
    return %c0_i32, %c0_i32_0 : i32, i32
  }
  func.func @transform_3(%arg0: i32, %arg1: i32) -> (i32, i32) {
    %c0_i32 = arith.constant 0 : i32
    %c0_i32_0 = arith.constant 0 : i32
    %c0_i32_1 = arith.constant 0 : i32
    return %c0_i32, %c0_i32_0 : i32, i32
  }
  func.func @transform_4(%arg0: i32, %arg1: i32) -> (i32, i32) {
    %c0_i32 = arith.constant 0 : i32
    %c0_i32_0 = arith.constant 0 : i32
    return %c0_i32, %arg1 : i32, i32
  }
  func.func @transform_5(%arg0: i32, %arg1: i32) -> (i32, i32) {
    %c0_i32 = arith.constant 0 : i32
    return %arg0, %arg1 : i32, i32
  }
}

</mosaic_0001>

<bundles_post_ra>
// kernel: tpu_custom_call.1
= control target key start
LH: loop header
LB: loop body
LE: loop exit
PB: predicated region body
PF: predicated region fallthrough
CT: control target
= control target key end

     0   :  { %10 = vsyncpa [#allocation3], 0  ;;  %s1658_s0 = inlined_call_operand.hbm [shape: bf16[256,256], index: 0, kind: input, shape index: {}]   ;;  %s1659_s1 = inlined_call_operand.hbm [shape: bf16[256,128], index: 1, kind: input, shape index: {}]   ;;  %s1660_s2 = inlined_call_operand.vmem [shape: f32[1,256], index: 2, kind: input, shape index: {}]   ;;  %s1661_s3 = inlined_call_operand.vmem [shape: f32[1,256], index: 3, kind: input, shape index: {}]   ;;  %s1662_s4 = inlined_call_operand.vmem [shape: f32[1,128], index: 4, kind: input, shape index: {}]   ;;  %s1663_s5 = inlined_call_operand.hbm [shape: f32[256,128], index: 5, kind: output, shape index: {}]  }
   0x1   :  { %12 = vsyncpa [#allocation3 + $0x1], 0 }
   0x2   :  { %13 = vsyncpa [#allocation6], 0 }
   0x3   :  { %14 = vsyncpa [#allocation4], 0 }
   0x4   :  { %16 = vsyncpa [#allocation4 + $0x1], 0  ;;  %s1306_s18 = smov 0   ;;  %s1308_s19 = smov 0  }
   0x5   :  { %s1310_s20 = smov 0   ;;  %s1312_s21 = smov 0  }
   0x6   :  { %s1314_s22 = smov 0   ;;  %s1316_s23 = smov 0  }
   0x7 LB: > { %s908_s4 = sadd.s32 4294967295, %s1265_s23   ;;  %s909_s24 = sadd.s32 4294967294, %s1265_s23   ;;  %s1265_s23 = sphi %s1316_s23, %s22_s23   ;;  %s1261_s22 = sphi %s1314_s22, %s1687_s22   ;;  %s1257_s21 = sphi %s1312_s21, %s1686_s21   ;;  %s1253_s20 = sphi %s1310_s20, %s1685_s20   ;;  %s1249_s19 = sphi %s1308_s19, %s1684_s19   ;;  %s1245_s18 = sphi %s1306_s18, %s1683_s18  }
   0x8   : > { %p54_p0 = scmp.ne.s32.totalorder %s1249_s19, %s1245_s18  ;;  %p1340_p1 = scmp.eq.s32.totalorder %s908_s4, 0 }
   0x9   : > { %p1344_p2 = scmp.eq.s32.totalorder %s908_s4, 1  ;;  %p180_p3 = scmp.eq.s32.totalorder %s909_s24, 1 }
   0xa   : > { %s1668_s25 = scalar_select %p1340_p1, 1, 0 }
   0xb   : > { %s1669_s26 = scalar_select %p1344_p2, 1, 0 }
   0xc   : > { %p1350_p4 = por %p1340_p1, %p54_p0  ;;  %p910_p5 = scmp.ge.s32.totalorder %s1265_s23, 1 }
   0xd   : > { %p1355_p6 = por %p180_p3, %p54_p0  ;;  %p187_p7 = scmp.lt.s32.totalorder %s1265_s23, 3 }
   0xe   : > { %s1670_s27 = scalar_select %p1350_p4, 1, 0 }
   0xf   : > { %s1671_s28 = scalar_select %p1355_p6, 1, 0 }
  0x10   : > { %p1360_p8 = pnand %p910_p5, %p187_p7  ;;  %s1267_s30 = smov [#allocation5]  }
  0x11   : > { %s201_s6 = sshll.u32 %s1267_s30, 4  ;;  %s34_s8 = sadd.s32 1, %s1261_s22  ;;  %s202_s6 = int_to_ptr.vmem [resolvable:$true] %s201_s6 }
  0x12   : > { %s1672_s29 = scalar_select %p1360_p8, 1, 0 }
  0x13   : > { %p1034_p9 = pneg %p1360_p8  ;;  %s1121_s11 = scalar_lea.hbm %s1659_s1, 2048 }
  0x14   : > { %p1122_p12 = scmp.ne.s32.totalorder %s1659_s1, %s1121_s11  ;;  %p1128_p5 = scmp.lt.u32.totalorder %s1121_s11, %s1659_s1 }
  0x15   : > { %p1369_p11 = pnand %p1034_p9, %p1340_p1 }
  0x17   : > { %p1123_p13 = pneg %p1369_p11 }
  0x19   : > { %p1124_p0 = pnand %p1123_p13, %p1122_p12 }
  0x1b   : > { %p1125_p3 = pneg %p1124_p0 }
  0x1d   : > { %p1130_p7 = pnand %p1128_p5, %p1125_p3 }
  0x1f   : > { %1133 = shalt.err (!%p1130_p7)
}
  0x20   : > { %s1134_s16 = scalar_lea.vmem %s202_s6, 2048  ;;  %p1142_p1 = scmp.lt.s32.totalorder %s202_s6, %s202_s6 }
  0x21   : > { %p1135_p9 = scmp.ne.s32.totalorder %s202_s6, %s1134_s16  ;;  %p1143_p4 = scmp.lt.s32.totalorder %s1134_s16, %s1134_s16 }
  0x23   : > { %p1137_p10 = pnand %p1135_p9, %p1123_p13  ;;  %p1144_p8 = por %p1143_p4, %p1142_p1 }
  0x25   : > { %p1138_p6 = pneg %p1137_p10 }
  0x27   : > { %p1145_p2 = pnand %p1144_p8, %p1138_p6 }
  0x29   : > { %1148 = shalt.err (!%p1145_p2)
}
  0x2a   : > { %s1268_s17 = smov 64   ;;  %s1269_s4 = smov 4  }
  0x2b   : > { %1037 = dma.hbm_to_vmem [thread:$0]  (!%p1369_p11), %s1659_s1, 2048, %s202_s6, [#allocation6], %s1268_s17, %s1268_s17, %s1269_s4  }
  0x2c   : > { %p36_p1 = scmp.ge.s32.totalorder %s34_s8, 2  ;;  %s41_s9 = sadd.s32 1, %s1253_s20 }
  0x2d   : > { %p48_p2 = scmp.ne.s32.totalorder %s1253_s20, %s1249_s19  ;;  %p49_p4 = scmp.eq.s32.totalorder %s1265_s23, 0 }
  0x2e   : > { %s1689_s8 = smov (%p36_p1, %s34_s8), 0  ;;  %p1675_p8 = scmp.ne.s32.totalorder %s1669_s26, 0 }
  0x2f   : > { %p1396_p6 = por %p49_p4, %p48_p2  ;;  %s38_s7 = ssub.s32 %s1261_s22, %s1689_s8 }
  0x30   : > { %p1402_p10 = por %p1675_p8, %p48_p2  ;;  %p1047_p12 = scmp.lt.s32.totalorder %s1265_s23, 2 }
  0x31   : > { %p39_p11 = scmp.eq.s32.totalorder %s38_s7, 0  ;;  %s227_s6 = sand.u32 1, %s1253_s20  }
  0x32   : > { %s914_s12 = sshll.u32 %s227_s6, 7  ;;  %s944_s14 = sshll.u32 %s1261_s22, 11 }
  0x33   : > { %s1411_s13 = scalar_select %p39_p11, %s1253_s20, %s41_s9  }
  0x34   : > { %s1417_s17 = scalar_lea.hbm %s1658_s0, %s944_s14  ;;  %s231_s26 = scalar_lea.vmem [#allocation2], %s914_s12 }
  0x35   : > { %s239_s4 = sshll.u32 %s231_s26, 4  ;;  %p1423_p13 = pnand %p1047_p12, %p1396_p6  ;;  %s1419_s4 = int_to_ptr.vmem [resolvable:$true] %s239_s4 }
  0x36   : > { %s1427_s30 = scalar_lea.sflag [#allocation3], %s227_s6  ;;  %s1149_s9 = scalar_lea.hbm %s1417_s17, 2048 }
  0x37   : > { %p1150_p0 = scmp.ne.s32.totalorder %s1417_s17, %s1149_s9  ;;  %p1151_p3 = pneg %p1423_p13 }
  0x38   : > { %s1154_s10 = scalar_lea.hbm %s1658_s0, 4096  ;;  %p1155_p9 = scmp.lt.u32.totalorder %s1417_s17, %s1658_s0 }
  0x39   : > { %p1152_p5 = pnand %p1151_p3, %p1150_p0  ;;  %p1156_p1 = scmp.lt.u32.totalorder %s1154_s10, %s1149_s9 }
  0x3a   : > { %p1158_p4 = scmp.lt.u32.totalorder %s1149_s9, %s1417_s17 }
  0x3b   : > { %p1153_p7 = pneg %p1152_p5  ;;  %p1157_p2 = por %p1156_p1, %p1155_p9 }
  0x3d   : > { %p1159_p6 = por %p1158_p4, %p1157_p2 }
  0x3f   : > { %p1160_p8 = pnand %p1159_p6, %p1153_p7 }
  0x41   : > { %1163 = shalt.err (!%p1160_p8)
}
  0x42   : > { %s1164_s6 = scalar_lea.vmem %s1419_s4, 2048  ;;  %s1270_s16 = smov [#allocation2]  }
  0x43   : > { %p1165_p12 = scmp.ne.s32.totalorder %s1419_s4, %s1164_s6  ;;  %s1169_s26 = sshll.u32 %s1270_s16, 4  ;;  %s1170_s26 = int_to_ptr.vmem [resolvable:$false] %s1169_s26 }
  0x44   : > { %s1171_s7 = scalar_lea.vmem %s1170_s26, 4096  ;;  %p1172_p5 = scmp.lt.s32.totalorder %s1419_s4, %s1170_s26 }
  0x45   : > { %p1167_p11 = pnand %p1165_p12, %p1151_p3  ;;  %p1173_p9 = scmp.lt.s32.totalorder %s1171_s7, %s1164_s6 }
  0x47   : > { %p1168_p0 = pneg %p1167_p11  ;;  %p1174_p1 = por %p1173_p9, %p1172_p5 }
  0x49   : > { %p1175_p2 = pnand %p1174_p1, %p1168_p0 }
  0x4b   : > { %1178 = shalt.err (!%p1175_p2)
}
  0x4c   : > { %s1271_s9 = smov 128   ;;  %s1272_s12 = smov 8  }
  0x4d   : > { %1041 = dma.hbm_to_vmem [thread:$0]  (!%p1423_p13), %s1417_s17, 2048, %s1419_s4, %s1427_s30, %s1271_s9, %s1271_s9, %s1272_s12  }
  0x4e   : > { %p1678_p3 = scmp.ne.s32.totalorder %s1672_s29, 0 }
  0x4f   : > { %s1458_s10 = sand.u32 (!%p1678_p3), 1, %s1249_s19   ;;  %p1679_p7 = scmp.ne.s32.totalorder (!%p1678_p3), %s1670_s27, 0 }
  0x50   : > { %251 = sbr.rel (%p1678_p3) target bundleno = 386 (0x182), region = 40  ;;  %s919_s14 = sshll.u32 (!%p1678_p3), %s1458_s10, 7 }
  0x51   : > { %s254_s15 = scalar_lea.sflag (!%p1678_p3), [#allocation3], %s1458_s10  ;;  %s1464_s6 = scalar_lea.vmem (!%p1678_p3), [#allocation2], %s919_s14 }
  0x57   : > { %1232 = dma.done.wait (%p1679_p7), %s254_s15, 2048  }
  0x58   : > { %1234 = vsyncadd (%p1679_p7), %s254_s15, 4294965248  ;;  %p1680_p13 = scmp.ne.s32.totalorder %s1668_s25, 0 }
  0x5a   : > { %1236 = dma.done.wait (%p1680_p13), [#allocation6], 2048  }
  0x5b   : > { %1238 = vsyncadd (%p1680_p13), [#allocation6], 4294965248  ;;  %v1105_v0 = vld [vmem:[#allocation5 + $0x40] sm:$0xff]   ;;  %v1107_v2 = vld [vmem:[#allocation5 + $0x48] sm:$0xff]   ;;  %v347_v5 = vlaneseq  ;;  %s1584_s4 = scalar_lea.vmem [#allocation7], %s919_s14  ;;  %s945_s24 = sshll.u32 %s1257_s21, 11 }
  0x5c   : > { %v1106_v1 = vld [vmem:[#allocation5] sm:$0xff]   ;;  %946 = vmatprep.subr.bf16.mxu0 %v1105_v0  ;;  %1010 = vmatprep.subr.bf16.mxu1 %v1105_v0  ;;  %v1108_v3 = vld [vmem:[#allocation5 + $0x8] sm:$0xff]   ;;  %v1109_v4 = vld [vmem:[#allocation5 + $0x50] sm:$0xff]   ;;  %s801_s30 = sshll.u32 %s1584_s4, 4  ;;  %s1605_s7 = scalar_lea.hbm %s1663_s5, %s945_s24  ;;  %s1607_s30 = int_to_ptr.vmem [resolvable:$true] %s801_s30 }
  0x5d   : > { %947 = vmatpush3.bf16.msra.mxu0 %v1106_v1  ;;  %1018 = vmatpush3.bf16.msra.mxu1 %v1106_v1  ;;  %v1110_v6 = vld [vmem:[#allocation5 + $0x10] sm:$0xff]   ;;  %v1111_v7 = vld [vmem:[#allocation5 + $0x58] sm:$0xff]   ;;  %v348_v8 = vshrl.u32 %v347_v5, 7  ;;  %v1113_v10 = vld [vmem:[#allocation5 + $0x60] sm:$0xff]   ;;  %s787_s21 = scalar_lea.sflag [#allocation4], %s1458_s10  ;;  %s1179_s9 = scalar_lea.vmem %s1607_s30, 2048 }
  0x5e   : > { %948 = vmatprep.subr.bf16.mxu0 %v1107_v2  ;;  %1011 = vmatprep.subr.bf16.mxu1 %v1107_v2  ;;  %v1112_v9 = vld [vmem:[#allocation5 + $0x18] sm:$0xff]   ;;  %v1114_v12 = vld [vmem:[#allocation5 + $0x20] sm:$0xff]   ;;  %v1115_v14 = vld [vmem:[#allocation5 + $0x68] sm:$0xff]   ;;  %p1180_p4 = scmp.ne.s32.totalorder %s1607_s30, %s1179_s9  ;;  %s1273_s12 = smov [#allocation7]  }
  0x5f   : > { %v349_v11 = vsub.s32 0, %v348_v8  ;;  %v353_v13 = vsub.s32 1, %v348_v8  ;;  %v297_v15 = vld [vmem:[%s1464_s6] sm:$0xff]  ;;  %v298_v16 = vld [vmem:[%s1464_s6 + $0x8] sm:$0xff]  ;;  %v1493_v29 = vld [vmem:[%s1464_s6 + $0x10] sm:$0xff]  ;;  %s1183_s14 = sshll.u32 %s1273_s12, 4  ;;  %s1184_s14 = int_to_ptr.vmem [resolvable:$false] %s1183_s14 }
  0x60   : > { %v345_v17 = vld [vmem:[%s1660_s2] sm:$0x3]  ;;  %v313_v18 = vunpack.c.l.bf16 %v297_v15  ;;  %v314_v19 = vunpack.c.h.bf16 %v297_v15  ;;  %v315_v20 = vunpack.c.l.bf16 %v298_v16  ;;  %v316_v21 = vunpack.c.h.bf16 %v298_v16  ;;  %v306_v24 = vld [vmem:[%s1464_s6 + $0x48] sm:$0xff]  ;;  %v1117_v35 = vld [vmem:[#allocation5 + $0x70] sm:$0xff]   ;;  %p1181_p6 = pnand %p1180_p4, %p1402_p10  ;;  %s1185_s15 = scalar_lea.vmem %s1184_s14, 4096 }
  0x61   : > { %949 = vmatpush3.bf16.msra.mxu0 %v1108_v3  ;;  %1019 = vmatpush3.bf16.msra.mxu1 %v1108_v3  ;;  %v389_v22 = vld [vmem:[%s1661_s3] sm:$0x3]  ;;  %v1484_v25 = vrot.slane %v345_v17, %v349_v11  ;;  %v1486_v26 = vrot.slane %v345_v17, %v353_v13  ;;  %v1116_v30 = vld [vmem:[#allocation5 + $0x28] sm:$0xff]   ;;  %v331_v33 = vunpack.c.l.bf16 %v306_v24  ;;  %v332_v34 = vunpack.c.h.bf16 %v306_v24  ;;  %v1499_v39 = vld [vmem:[%s1464_s6 + $0x18] sm:$0xff]  ;;  %p1186_p12 = scmp.lt.s32.totalorder %s1607_s30, %s1184_s14  ;;  %p1187_p11 = scmp.lt.s32.totalorder %s1185_s15, %s1179_s9 }
  0x62   : > { %950 = vmatprep.subr.bf16.mxu0 %v1109_v4  ;;  %1012 = vmatprep.subr.bf16.mxu1 %v1109_v4  ;;  %v305_v23 = vld [vmem:[%s1464_s6 + $0x40] sm:$0xff]  ;;  %v1488_v27 = vrot.slane %v389_v22, %v349_v11  ;;  %v1490_v28 = vrot.slane %v389_v22, %v353_v13  ;;  %v318_v40 = vunpack.c.h.bf16 %v1493_v29  ;;  %v1118_v49 = vld [vmem:[#allocation5 + $0x30] sm:$0xff]   ;;  %v1119_v50 = vld [vmem:[#allocation5 + $0x78] sm:$0xff]   ;;  %v320_v54 = vunpack.c.h.bf16 %v1499_v39  ;;  %p1182_p8 = pneg %p1181_p6 }
  0x63   : > { %v329_v31 = vunpack.c.l.bf16 %v305_v23  ;;  %v330_v32 = vunpack.c.h.bf16 %v305_v23  ;;  %v358_v36 = vmul.f32 %v1486_v26, %v314_v19  ;;  %v360_v37 = vmul.f32 %v1486_v26, %v316_v21  ;;  %v1515_v61 = vld [vmem:[%s1464_s6 + $0x50] sm:$0xff]  ;;  %v1120_v62 = vld [vmem:[#allocation5 + $0x38] sm:$0xff]   ;;  %p1188_p0 = por %p1187_p11, %p1186_p12 }
  0x64   : > { %v357_v38 = vmul.f32 %v1484_v25, %v313_v18  ;;  %v376_v42 = vmul.f32 %v1486_v26, %v332_v34  ;;  %v359_v43 = vmul.f32 %v1484_v25, %v315_v20  ;;  %v375_v48 = vmul.f32 %v1484_v25, %v331_v33 }
  0x65   : > { %951 = vmatpush3.bf16.msra.mxu0 %v1110_v6  ;;  %1020 = vmatpush3.bf16.msra.mxu1 %v1110_v6  ;;  %v374_v41 = vmul.f32 %v1486_v26, %v330_v32  ;;  %v373_v44 = vmul.f32 %v1484_v25, %v329_v31  ;;  %v402_v45 = vadd.f32 %v1490_v28, %v358_v36  ;;  %v334_v11 = vunpack.c.h.bf16 %v1515_v61  ;;  %p1189_p5 = pnand %p1188_p0, %p1182_p8 }
  0x66   : > { %952 = vmatprep.subr.bf16.mxu0 %v1111_v7  ;;  %1013 = vmatprep.subr.bf16.mxu1 %v1111_v7  ;;  %v404_v46 = vadd.f32 %v1490_v28, %v360_v37  ;;  %v401_v47 = vadd.f32 %v1488_v27, %v357_v38  ;;  %v420_v52 = vadd.f32 %v1490_v28, %v376_v42  ;;  %v317_v21 = vunpack.c.l.bf16 %v1493_v29 }
  0x67   : > { %v418_v51 = vadd.f32 %v1490_v28, %v374_v41  ;;  %v403_v53 = vadd.f32 %v1488_v27, %v359_v43  ;;  %vm434_vm0 = vcmp.ge.f32.partialorder %v402_v45, 0.0  ;;  %v466_v55 = vmul.f32 0.2, %v402_v45 }
  0x68   : > { %vm436_vm1 = vcmp.ge.f32.partialorder %v404_v46, 0.0  ;;  %v468_v56 = vmul.f32 0.2, %v404_v46  ;;  %vm452_vm3 = vcmp.ge.f32.partialorder %v420_v52, 0.0  ;;  %v484_v58 = vmul.f32 0.2, %v420_v52 }
  0x69   : > { %953 = vmatpush3.bf16.msra.mxu0 %v1112_v9  ;;  %1021 = vmatpush3.bf16.msra.mxu1 %v1112_v9  ;;  %vm450_vm2 = vcmp.ge.f32.partialorder %v418_v51, 0.0  ;;  %v482_v57 = vmul.f32 0.2, %v418_v51  ;;  %v498_v59 = vsel %vm434_vm0, %v402_v45, %v466_v55  ;;  %vm433_vm4 = vcmp.ge.f32.partialorder %v401_v47, 0.0  ;;  %v309_v55 = vld [vmem:[%s1464_s6 + $0x60] sm:$0xff] }
  0x6a   : > { %954 = vmatprep.subr.bf16.mxu0 %v1113_v10  ;;  %1014 = vmatprep.subr.bf16.mxu1 %v1113_v10  ;;  %v500_v60 = vsel %vm436_vm1, %v404_v46, %v468_v56  ;;  %vm435_vm5 = vcmp.ge.f32.partialorder %v403_v53, 0.0  ;;  %v516_v1 = vsel %vm452_vm3, %v420_v52, %v484_v58  ;;  %v465_v2 = vmul.f32 0.2, %v401_v47  ;;  %v308_v10 = vld [vmem:[%s1464_s6 + $0x58] sm:$0xff]  ;;  %v310_v56 = vld [vmem:[%s1464_s6 + $0x68] sm:$0xff] }
  0x6b   : > { %v530_v63 = vpack.c.bf16 %v500_v60, %v498_v59  ;;  %v514_v0 = vsel %vm450_vm2, %v418_v51, %v482_v57  ;;  %v467_v4 = vmul.f32 0.2, %v403_v53  ;;  %v417_v5 = vadd.f32 %v1488_v27, %v373_v44  ;;  %v301_v44 = vld [vmem:[%s1464_s6 + $0x20] sm:$0xff] }
  0x6c   : > { %v538_v3 = vpack.c.bf16 %v516_v1, %v514_v0  ;;  %v419_v6 = vadd.f32 %v1488_v27, %v375_v48  ;;  %v497_v7 = vsel %vm433_vm4, %v401_v47, %v465_v2  ;;  %v362_v8 = vmul.f32 %v1486_v26, %v318_v40 }
  0x6d   : > { %955 = vmatpush3.bf16.msra.mxu0 %v1114_v12  ;;  %1022 = vmatpush3.bf16.msra.mxu1 %v1114_v12  ;;  %v364_v9 = vmul.f32 %v1486_v26, %v320_v54  ;;  %v499_v12 = vsel %vm435_vm5, %v403_v53, %v467_v4  ;;  %vm449_vm6 = vcmp.ge.f32.partialorder %v417_v5, 0.0  ;;  %v481_v13 = vmul.f32 0.2, %v417_v5 }
  0x6e   : > { %956 = vmatprep.subr.bf16.mxu0 %v1115_v14  ;;  %1015 = vmatprep.subr.bf16.mxu1 %v1115_v14  ;;  %vm451_vm7 = vcmp.ge.f32.partialorder %v419_v6, 0.0  ;;  %v529_v14 = vpack.c.bf16 %v499_v12, %v497_v7  ;;  %v483_v15 = vmul.f32 0.2, %v419_v6  ;;  %v406_v16 = vadd.f32 %v1490_v28, %v362_v8 }
  0x6f   : > { %705 = vmatprep.mubr.bf16.mxu0 %v530_v63  ;;  %737 = vmatprep.mubr.bf16.mxu1 %v538_v3  ;;  %v408_v17 = vadd.f32 %v1490_v28, %v364_v9  ;;  %v513_v18 = vsel %vm449_vm6, %v417_v5, %v481_v13  ;;  %v336_v19 = vunpack.c.h.bf16 %v308_v10  ;;  %v378_v20 = vmul.f32 %v1486_v26, %v334_v11 }
  0x70   : > { %v515_v22 = vsel %vm451_vm7, %v419_v6, %v483_v15  ;;  %vm438_vm8 = vcmp.ge.f32.partialorder %v406_v16, 0.0  ;;  %v470_v23 = vmul.f32 0.2, %v406_v16  ;;  %v319_v34 = vunpack.c.l.bf16 %v1499_v39  ;;  %v302_v39 = vld [vmem:[%s1464_s6 + $0x28] sm:$0xff] }
  0x71   : > { %957 = vmatpush3.bf16.msra.mxu0 %v1116_v30  ;;  %1023 = vmatpush3.bf16.msra.mxu1 %v1116_v30  ;;  %vm440_vm9 = vcmp.ge.f32.partialorder %v408_v17, 0.0  ;;  %v537_v24 = vpack.c.bf16 %v515_v22, %v513_v18  ;;  %v472_v30 = vmul.f32 0.2, %v408_v17  ;;  %v380_v31 = vmul.f32 %v1486_v26, %v336_v19 }
  0x72   : > { %958 = vmatprep.subr.bf16.mxu0 %v1117_v35  ;;  %1016 = vmatprep.subr.bf16.mxu1 %v1117_v35  ;;  %v422_v32 = vadd.f32 %v1490_v28, %v378_v20  ;;  %v502_v33 = vsel %vm438_vm8, %v406_v16, %v470_v23  ;;  %v361_v35 = vmul.f32 %v1484_v25, %v317_v21  ;;  %v333_v29 = vunpack.c.l.bf16 %v1515_v61 }
  0x73   : > { %v504_v36 = vsel %vm440_vm9, %v408_v17, %v472_v30  ;;  %v424_v37 = vadd.f32 %v1490_v28, %v380_v31  ;;  %v363_v41 = vmul.f32 %v1484_v25, %v319_v34  ;;  %v335_v43 = vunpack.c.l.bf16 %v308_v10 }
  0x74   : > { %vm454_vm10 = vcmp.ge.f32.partialorder %v422_v32, 0.0  ;;  %v486_v38 = vmul.f32 0.2, %v422_v32  ;;  %v532_v40 = vpack.c.bf16 %v504_v36, %v502_v33  ;;  %v405_v42 = vadd.f32 %v1488_v27, %v361_v35 }
  0x75   : > { %959 = vmatpush3.bf16.msra.mxu0 %v1118_v49  ;;  %1024 = vmatpush3.bf16.msra.mxu1 %v1118_v49  ;;  %vm456_vm11 = vcmp.ge.f32.partialorder %v424_v37, 0.0  ;;  %v488_v45 = vmul.f32 0.2, %v424_v37  ;;  %v377_v47 = vmul.f32 %v1484_v25, %v333_v29  ;;  %v407_v48 = vadd.f32 %v1488_v27, %v363_v41 }
  0x76   : > { %960 = vmatprep.subr.bf16.mxu0 %v1119_v50  ;;  %1017 = vmatprep.subr.bf16.mxu1 %v1119_v50  ;;  %v518_v46 = vsel %vm454_vm10, %v422_v32, %v486_v38  ;;  %vm437_vm12 = vcmp.ge.f32.partialorder %v405_v42, 0.0  ;;  %v469_v49 = vmul.f32 0.2, %v405_v42  ;;  %v379_v50 = vmul.f32 %v1484_v25, %v335_v43  ;;  %v304_v38 = vld [vmem:[%s1464_s6 + $0x38] sm:$0xff]  ;;  %v311_v43 = vld [vmem:[%s1464_s6 + $0x70] sm:$0xff] }
  0x77   : > { %v520_v51 = vsel %vm456_vm11, %v424_v37, %v488_v45  ;;  %v421_v52 = vadd.f32 %v1488_v27, %v377_v47  ;;  %v322_v53 = vunpack.c.h.bf16 %v301_v44  ;;  %v324_v54 = vunpack.c.h.bf16 %v302_v39 }
  0x78   : > { %v540_v57 = vpack.c.bf16 %v520_v51, %v518_v46  ;;  %vm439_vm13 = vcmp.ge.f32.partialorder %v407_v48, 0.0  ;;  %v471_v58 = vmul.f32 0.2, %v407_v48  ;;  %v501_v59 = vsel %vm437_vm12, %v405_v42, %v469_v49 }
  0x79   : > { %961 = vmatpush3.bf16.msra.mxu0 %v1120_v62  ;;  %1025 = vmatpush3.bf16.msra.mxu1 %v1120_v62  ;;  %v423_v60 = vadd.f32 %v1488_v27, %v379_v50  ;;  %vm453_vm14 = vcmp.ge.f32.partialorder %v421_v52, 0.0  ;;  %v485_v61 = vmul.f32 0.2, %v421_v52  ;;  %v366_v62 = vmul.f32 %v1486_v26, %v322_v53  ;;  %v312_v50 = vld [vmem:[%s1464_s6 + $0x78] sm:$0xff] }
  0x7a   : > { %v503_v63 = vsel %vm439_vm13, %v407_v48, %v471_v58  ;;  %v368_v0 = vmul.f32 %v1486_v26, %v324_v54  ;;  %v338_v1 = vunpack.c.h.bf16 %v309_v55  ;;  %v340_v2 = vunpack.c.h.bf16 %v310_v56 }
  0x7b   : > { %v531_v3 = vpack.c.bf16 %v503_v63, %v501_v59  ;;  %vm455_vm15 = vcmp.ge.f32.partialorder %v423_v60, 0.0  ;;  %v487_v4 = vmul.f32 0.2, %v423_v60  ;;  %v517_v5 = vsel %vm453_vm14, %v421_v52, %v485_v61 }
  0x7c   : > { %706 = vmatmul.mubr.bf16.vlgmr.msra.gmra.mrb[0].mxu0 %v529_v14  ;;  %738 = vmatmul.mubr.bf16.vlgmr.msra.gmra.mrb[0].mxu1 %v537_v24  ;;  %v410_v6 = vadd.f32 %v1490_v28, %v366_v62  ;;  %v412_v7 = vadd.f32 %v1490_v28, %v368_v0  ;;  %v382_v8 = vmul.f32 %v1486_v26, %v338_v1  ;;  %v321_v11 = vunpack.c.l.bf16 %v301_v44  ;;  %v303_v24 = vld [vmem:[%s1464_s6 + $0x30] sm:$0xff] }
  0x7d   : > { %713 = vmatprep.mubr.bf16.mxu0 %v532_v40  ;;  %745 = vmatprep.mubr.bf16.mxu1 %v540_v57  ;;  %v384_v9 = vmul.f32 %v1486_v26, %v340_v2  ;;  %v519_v10 = vsel %vm455_vm15, %v423_v60, %v487_v4  ;;  %v323_v12 = vunpack.c.l.bf16 %v302_v39  ;;  %v337_v13 = vunpack.c.l.bf16 %v309_v55 }
  0x7e   : > { %v539_v14 = vpack.c.bf16 %v519_v10, %v517_v5  ;;  %vm442_vm0 = vcmp.ge.f32.partialorder %v410_v6, 0.0  ;;  %vm444_vm1 = vcmp.ge.f32.partialorder %v412_v7, 0.0  ;;  %v474_v15 = vmul.f32 0.2, %v410_v6 }
  0x7f   : > { %v476_v16 = vmul.f32 0.2, %v412_v7  ;;  %v426_v17 = vadd.f32 %v1490_v28, %v382_v8  ;;  %v428_v18 = vadd.f32 %v1490_v28, %v384_v9  ;;  %v365_v19 = vmul.f32 %v1484_v25, %v321_v11 }
  0x80   : > { %v506_v20 = vsel %vm442_vm0, %v410_v6, %v474_v15  ;;  %v367_v21 = vmul.f32 %v1484_v25, %v323_v12  ;;  %v339_v22 = vunpack.c.l.bf16 %v310_v56  ;;  %v381_v23 = vmul.f32 %v1484_v25, %v337_v13 }
  0x81   : > { %v508_v30 = vsel %vm444_vm1, %v412_v7, %v476_v16  ;;  %vm458_vm2 = vcmp.ge.f32.partialorder %v426_v17, 0.0  ;;  %vm460_vm3 = vcmp.ge.f32.partialorder %v428_v18, 0.0  ;;  %v490_v31 = vmul.f32 0.2, %v426_v17 }
  0x82   : > { %v534_v32 = vpack.c.bf16 %v508_v30, %v506_v20  ;;  %v492_v33 = vmul.f32 0.2, %v428_v18  ;;  %v409_v34 = vadd.f32 %v1488_v27, %v365_v19  ;;  %v411_v35 = vadd.f32 %v1488_v27, %v367_v21 }
  0x83   : > { %v522_v29 = vsel %vm458_vm2, %v426_v17, %v490_v31  ;;  %v383_v36 = vmul.f32 %v1484_v25, %v339_v22  ;;  %v425_v37 = vadd.f32 %v1488_v27, %v381_v23  ;;  %v326_v40 = vunpack.c.h.bf16 %v303_v24 }
  0x84   : > { %714 = vmatmul.mubr.bf16.gmra.mrb[4].mxu0 %v531_v3  ;;  %746 = vmatmul.mubr.bf16.gmra.mrb[4].mxu1 %v539_v14  ;;  %v524_v41 = vsel %vm460_vm3, %v428_v18, %v492_v33  ;;  %vm441_vm4 = vcmp.ge.f32.partialorder %v409_v34, 0.0  ;;  %vm443_vm5 = vcmp.ge.f32.partialorder %v411_v35, 0.0  ;;  %v473_v42 = vmul.f32 0.2, %v409_v34 }
  0x85   : > { %721 = vmatprep.mubr.bf16.mxu0 %v534_v32  ;;  %v542_v44 = vpack.c.bf16 %v524_v41, %v522_v29  ;;  %v475_v39 = vmul.f32 0.2, %v411_v35  ;;  %v427_v45 = vadd.f32 %v1488_v27, %v383_v36  ;;  %vm457_vm6 = vcmp.ge.f32.partialorder %v425_v37, 0.0 }
  0x86   : > { %v505_v46 = vsel %vm441_vm4, %v409_v34, %v473_v42  ;;  %v489_v47 = vmul.f32 0.2, %v425_v37  ;;  %v328_v48 = vunpack.c.h.bf16 %v304_v38  ;;  %v370_v49 = vmul.f32 %v1486_v26, %v326_v40 }
  0x87   : > { %753 = vmatprep.mubr.bf16.mxu1 %v542_v44  ;;  %v507_v51 = vsel %vm443_vm5, %v411_v35, %v475_v39  ;;  %vm459_vm7 = vcmp.ge.f32.partialorder %v427_v45, 0.0  ;;  %v491_v52 = vmul.f32 0.2, %v427_v45  ;;  %v342_v53 = vunpack.c.h.bf16 %v311_v43 }
  0x88   : > { %v533_v54 = vpack.c.bf16 %v507_v51, %v505_v46  ;;  %v521_v55 = vsel %vm457_vm6, %v425_v37, %v489_v47  ;;  %v372_v56 = vmul.f32 %v1486_v26, %v328_v48  ;;  %v414_v57 = vadd.f32 %v1490_v28, %v370_v49 }
  0x89   : > { %v523_v58 = vsel %vm459_vm7, %v427_v45, %v491_v52  ;;  %v344_v59 = vunpack.c.h.bf16 %v312_v50  ;;  %v386_v60 = vmul.f32 %v1486_v26, %v342_v53  ;;  %v325_v61 = vunpack.c.l.bf16 %v303_v24 }
  0x8a   : > { %v541_v62 = vpack.c.bf16 %v523_v58, %v521_v55  ;;  %v416_v63 = vadd.f32 %v1490_v28, %v372_v56  ;;  %vm446_vm8 = vcmp.ge.f32.partialorder %v414_v57, 0.0  ;;  %v478_v0 = vmul.f32 0.2, %v414_v57 }
  0x8b   : > { %v388_v1 = vmul.f32 %v1486_v26, %v344_v59  ;;  %v430_v2 = vadd.f32 %v1490_v28, %v386_v60  ;;  %v327_v3 = vunpack.c.l.bf16 %v304_v38  ;;  %v369_v4 = vmul.f32 %v1484_v25, %v325_v61 }
  0x8c   : > { %722 = vmatmul.mubr.bf16.gmra.mrb[8].mxu0 %v533_v54  ;;  %754 = vmatmul.mubr.bf16.gmra.mrb[8].mxu1 %v541_v62  ;;  %vm448_vm9 = vcmp.ge.f32.partialorder %v416_v63, 0.0  ;;  %v480_v5 = vmul.f32 0.2, %v416_v63  ;;  %v510_v6 = vsel %vm446_vm8, %v414_v57, %v478_v0  ;;  %v341_v7 = vunpack.c.l.bf16 %v311_v43 }
  0x8d   : > { %v432_v8 = vadd.f32 %v1490_v28, %v388_v1  ;;  %vm462_vm10 = vcmp.ge.f32.partialorder %v430_v2, 0.0  ;;  %v494_v9 = vmul.f32 0.2, %v430_v2  ;;  %v371_v10 = vmul.f32 %v1484_v25, %v327_v3 }
  0x8e   : > { %v512_v11 = vsel %vm448_vm9, %v416_v63, %v480_v5  ;;  %v413_v12 = vadd.f32 %v1488_v27, %v369_v4  ;;  %v343_v26 = vunpack.c.l.bf16 %v312_v50  ;;  %v385_v13 = vmul.f32 %v1484_v25, %v341_v7 }
  0x8f   : > { %v536_v14 = vpack.c.bf16 %v512_v11, %v510_v6  ;;  %vm464_vm11 = vcmp.ge.f32.partialorder %v432_v8, 0.0  ;;  %v496_v15 = vmul.f32 0.2, %v432_v8  ;;  %v526_v16 = vsel %vm462_vm10, %v430_v2, %v494_v9 }
  0x90   : > { %v415_v17 = vadd.f32 %v1488_v27, %v371_v10  ;;  %vm445_vm12 = vcmp.ge.f32.partialorder %v413_v12, 0.0  ;;  %v477_v18 = vmul.f32 0.2, %v413_v12  ;;  %v387_v28 = vmul.f32 %v1484_v25, %v343_v26 }
  0x91   : > { %729 = vmatprep.mubr.bf16.mxu0 %v536_v14  ;;  %v528_v19 = vsel %vm464_vm11, %v432_v8, %v496_v15  ;;  %v429_v20 = vadd.f32 %v1488_v27, %v385_v13 }
  0x92   : > { %v544_v21 = vpack.c.bf16 %v528_v19, %v526_v16  ;;  %vm447_vm13 = vcmp.ge.f32.partialorder %v415_v17, 0.0  ;;  %v479_v22 = vmul.f32 0.2, %v415_v17  ;;  %v509_v23 = vsel %vm445_vm12, %v413_v12, %v477_v18 }
  0x93   : > { %v431_v24 = vadd.f32 %v1488_v27, %v387_v28  ;;  %vm461_vm14 = vcmp.ge.f32.partialorder %v429_v20, 0.0  ;;  %v493_v30 = vmul.f32 0.2, %v429_v20 }
  0x94   : > { %761 = vmatprep.mubr.bf16.mxu1 %v544_v21  ;;  %v511_v31 = vsel %vm447_vm13, %v415_v17, %v479_v22 }
  0x95   : > { %v535_v32 = vpack.c.bf16 %v511_v31, %v509_v23  ;;  %vm463_vm15 = vcmp.ge.f32.partialorder %v431_v24, 0.0  ;;  %v495_v33 = vmul.f32 0.2, %v431_v24  ;;  %v525_v34 = vsel %vm461_vm14, %v429_v20, %v493_v30 }
  0x97   : > { %730 = vmatmul.mubr.bf16.gmra.mrb[12].mxu0 %v535_v32  ;;  %v527_v25 = vsel %vm463_vm15, %v431_v24, %v495_v33 }
  0x98   : > { %v543_v35 = vpack.c.bf16 %v527_v25, %v525_v34 }
  0x9a   : > { %762 = vmatmul.mubr.bf16.gmra.mrb[12].mxu1 %v543_v35 }
 0x14f   : > { %v962_v29 = vpop.f32.mrb[0].mxu0  ;;  %v986_v37 = vpop.f32.mrb[0].mxu1 }
 0x150   : > { %v963_v36 = vpop.f32.mrb[1].mxu0  ;;  %v987_v41 = vpop.f32.mrb[1].mxu1 }
 0x151   : > { %v964_v38 = vadd.f32 %v963_v36, %v962_v29  ;;  %v965_v40 = vpop.f32.mrb[2].mxu0  ;;  %v988_v42 = vadd.f32 %v987_v41, %v986_v37  ;;  %v989_v43 = vpop.f32.mrb[2].mxu1 }
 0x152   : > { %v966_v27 = vpop.f32.mrb[3].mxu0  ;;  %v990_v39 = vpop.f32.mrb[3].mxu1 }
 0x153   : > { %770 = vst [vmem:[%s1584_s4] sm:$0xff] %v964_v38  ;;  %v967_v44 = vadd.f32 %v966_v27, %v965_v40  ;;  %778 = vst [vmem:[%s1584_s4 + $0x40] sm:$0xff] %v988_v42  ;;  %v991_v45 = vadd.f32 %v990_v39, %v989_v43 }
 0x155   : > { %771 = vst [vmem:[%s1584_s4 + $0x8] sm:$0xff] %v967_v44  ;;  %779 = vst [vmem:[%s1584_s4 + $0x48] sm:$0xff] %v991_v45 }
 0x157   : > { %v968_v46 = vpop.f32.mrb[4].mxu0  ;;  %v992_v50 = vpop.f32.mrb[4].mxu1 }
 0x158   : > { %v969_v47 = vpop.f32.mrb[5].mxu0  ;;  %v993_v52 = vpop.f32.mrb[5].mxu1 }
 0x159   : > { %v970_v48 = vadd.f32 %v969_v47, %v968_v46  ;;  %v971_v49 = vpop.f32.mrb[6].mxu0  ;;  %v994_v54 = vadd.f32 %v993_v52, %v992_v50  ;;  %v995_v55 = vpop.f32.mrb[6].mxu1 }
 0x15a   : > { %v972_v51 = vpop.f32.mrb[7].mxu0  ;;  %v996_v56 = vpop.f32.mrb[7].mxu1 }
 0x15b   : > { %772 = vst [vmem:[%s1584_s4 + $0x10] sm:$0xff] %v970_v48  ;;  %v973_v53 = vadd.f32 %v972_v51, %v971_v49  ;;  %780 = vst [vmem:[%s1584_s4 + $0x50] sm:$0xff] %v994_v54  ;;  %v997_v57 = vadd.f32 %v996_v56, %v995_v55 }
 0x15d   : > { %773 = vst [vmem:[%s1584_s4 + $0x18] sm:$0xff] %v973_v53  ;;  %781 = vst [vmem:[%s1584_s4 + $0x58] sm:$0xff] %v997_v57 }
 0x15f   : > { %v974_v58 = vpop.f32.mrb[8].mxu0  ;;  %v998_v60 = vpop.f32.mrb[8].mxu1 }
 0x160   : > { %v975_v59 = vpop.f32.mrb[9].mxu0  ;;  %v999_v63 = vpop.f32.mrb[9].mxu1 }
 0x161   : > { %v976_v61 = vadd.f32 %v975_v59, %v974_v58  ;;  %v977_v62 = vpop.f32.mrb[10].mxu0  ;;  %v1000_v1 = vadd.f32 %v999_v63, %v998_v60  ;;  %v1001_v2 = vpop.f32.mrb[10].mxu1 }
 0x162   : > { %v978_v0 = vpop.f32.mrb[11].mxu0  ;;  %v1002_v4 = vpop.f32.mrb[11].mxu1 }
 0x163   : > { %774 = vst [vmem:[%s1584_s4 + $0x20] sm:$0xff] %v976_v61  ;;  %v979_v3 = vadd.f32 %v978_v0, %v977_v62  ;;  %782 = vst [vmem:[%s1584_s4 + $0x60] sm:$0xff] %v1000_v1  ;;  %v1003_v5 = vadd.f32 %v1002_v4, %v1001_v2 }
 0x165   : > { %775 = vst [vmem:[%s1584_s4 + $0x28] sm:$0xff] %v979_v3  ;;  %783 = vst [vmem:[%s1584_s4 + $0x68] sm:$0xff] %v1003_v5 }
 0x16a   : > { %v980_v6 = vpop.f32.mrb[12].mxu0 }
 0x16b   : > { %v981_v7 = vpop.f32.mrb[13].mxu0 }
 0x16c   : > { %v982_v8 = vadd.f32 %v981_v7, %v980_v6  ;;  %v983_v9 = vpop.f32.mrb[14].mxu0 }
 0x16d   : > { %v1004_v10 = vpop.f32.mrb[12].mxu1  ;;  %v984_v11 = vpop.f32.mrb[15].mxu0 }
 0x16e   : > { %776 = vst [vmem:[%s1584_s4 + $0x30] sm:$0xff] %v982_v8  ;;  %v1005_v12 = vpop.f32.mrb[13].mxu1  ;;  %v985_v26 = vadd.f32 %v984_v11, %v983_v9 }
 0x16f   : > { %v1006_v13 = vadd.f32 %v1005_v12, %v1004_v10  ;;  %v1007_v14 = vpop.f32.mrb[14].mxu1 }
 0x170   : > { %777 = vst [vmem:[%s1584_s4 + $0x38] sm:$0xff] %v985_v26  ;;  %v1008_v15 = vpop.f32.mrb[15].mxu1 }
 0x171   : > { %784 = vst [vmem:[%s1584_s4 + $0x70] sm:$0xff] %v1006_v13  ;;  %v1009_v16 = vadd.f32 %v1008_v15, %v1007_v14 }
 0x173   : > { %785 = vst [vmem:[%s1584_s4 + $0x78] sm:$0xff] %v1009_v16 }
 0x174   : > { %1192 = shalt.err (!%p1189_p5)
}
 0x175   : > { %s1193_s6 = scalar_lea.hbm %s1605_s7, 2048  ;;  %s1197_s29 = scalar_lea.hbm %s1663_s5, 4096 }
 0x176   : > { %p1194_p9 = scmp.ne.s32.totalorder %s1605_s7, %s1193_s6  ;;  %p1198_p3 = scmp.lt.u32.totalorder %s1605_s7, %s1663_s5 }
 0x177   : > { %p1199_p7 = scmp.lt.u32.totalorder %s1197_s29, %s1193_s6  ;;  %p1201_p4 = scmp.lt.u32.totalorder %s1193_s6, %s1605_s7 }
 0x178   : > { %p1195_p1 = pnand %p1194_p9, %p1402_p10 }
 0x179   : > { %p1200_p13 = por %p1199_p7, %p1198_p3 }
 0x17a   : > { %p1196_p2 = pneg %p1195_p1 }
 0x17b   : > { %p1202_p6 = por %p1201_p4, %p1200_p13 }
 0x17d   : > { %p1203_p8 = pnand %p1202_p6, %p1196_p2 }
 0x17f   : > { %1206 = shalt.err (!%p1203_p8)
}
 0x180   : > { %s1274_s24 = smov 128   ;;  %s1275_s16 = smov 8  }
 0x181   : > { %1032 = dma.vmem_to_hbm [thread:$0]  (%p1402_p10), %s1607_s30, 2048, %s1605_s7, %s787_s21, %s1274_s24, %s1274_s24, %s1275_s16  }
 0x182 PF: > { %s816_s26 = sand.u32 1, %s1245_s18   ;;  %p1681_p12 = scmp.ne.s32.totalorder %s1671_s28, 0 }
 0x183   : > { %p1682_p11 = scmp.ge.s32.totalorder %s1265_s23, 2  ;;  %s817_s9 = scalar_lea.sflag [#allocation4], %s816_s26 }
 0x185   : > { %p1043_p0 = pnand %p1682_p11, %p1681_p12 }
 0x187   : > { %1240 = dma.done.wait (!%p1043_p0), %s817_s9, 2048  }
 0x188   : > { %1242 = vsyncadd (!%p1043_p0), %s817_s9, 4294965248  ;;  %s22_s23 = sadd.s32 1, %s1265_s23   ;;  %s1683_s18 = smov %s1249_s19 }
 0x189   : > { %p19_p5 = scmp.ge.s32.totalorder %s22_s23, 4   ;;  %s1684_s19 = smov %s1253_s20 }
 0x18a   : > { %s1685_s20 = smov %s1411_s13  ;;  %s1686_s21 = smov %s1261_s22 }
 0x18b   : > { %s1687_s22 = smov %s1689_s8  ;;  %21 = sbr.rel (!%p19_p5) target bundleno = 7 (0x7), region = 93 }
 0x192   :  { %822 = vsyncpa [#allocation3], 1 }
 0x193   :  { %824 = vsyncpa [#allocation3 + $0x1], 1 }
 0x194   :  { %825 = vsyncpa [#allocation6], 1 }
 0x195   :  { %826 = vsyncpa [#allocation4], 1 }
 0x196   :  { %828 = vsyncpa [#allocation4 + $0x1], 1 }

</bundles_post_ra>
